<compile_context>
chip_gen: v7x
topology: tpu7x:2x2x1
jax: 0.10.0
libtpu: 0.0.40
codegen_flags: <defaults>
</compile_context>

<pallas_src>
import math

import jax
import jax.numpy as jnp
from jax.experimental import pallas as pl
from jax.experimental.pallas import tpu as pltpu  # noqa: F401  (TPU backend)

EPS = 1e-5
LANE = 128  # lane-dense output width


def _bn_relu(h):
    """BatchNorm1d (train mode, gamma=1, beta=0) + ReLU, single-pass stats."""
    inv_n = 1.0 / h.shape[0]
    s = jnp.sum(h, axis=0, keepdims=True)            # (1, F)
    ss = jnp.sum(h * h, axis=0, keepdims=True)       # (1, F)  -- independent of s
    mean = s * inv_n
    var = jnp.maximum(ss * inv_n - mean * mean, 0.0)  # biased variance
    return jnp.maximum((h - mean) * jax.lax.rsqrt(var + EPS), 0.0)


def mlp_kernel(x_ref, w1_ref, w2_ref, wcp_ref, bcp_ref, o_ref):
    x = x_ref[...]                      # (N, in_dim)
    w1 = w1_ref[...]                    # (in_dim, H)
    in_dim = x_ref.shape[1]

    # ---- Layer 1: Linear (K = in_dim = 2) as VPU broadcast multiply-add.
    #      Bias b1 is dropped: it cancels exactly under the following BN.
    h = x[:, 0:1] * w1[0:1, :]
    for i in range(1, in_dim):
        h = h + x[:, i:i + 1] * w1[i:i + 1, :]
    h = _bn_relu(h)

    # ---- Layer 2: 32x32 Linear on the MXU (bias b2 dropped, cancelled by BN).
    h = jnp.dot(h, w2_ref[...], preferred_element_type=jnp.float32)
    h = _bn_relu(h)

    # ---- Classifier: one MXU dot against the zero-padded (H, 128) weight slab,
    #      landing lane-dense in the (N, 128) output (unmasked full-lane stores).
    logits = jnp.dot(h, wcp_ref[...], preferred_element_type=jnp.float32)
    o_ref[...] = (logits + bcp_ref[...]).astype(o_ref.dtype)


@jax.jit
def net_forward(x, params):
    """x: (N, input_dim) f32. params: dict from init_params() (includes wcp/bcp)."""
    N = x.shape[0]
    out_dim = params["wc"].shape[1]

    # b1/b2 intentionally NOT passed (BN cancels them); classifier weight/bias are
    # the precomputed lane-padded versions ("wcp": (H, 128), "bcp": (1, 128)).
    args = (x, params["w1"], params["w2"], params["wcp"], params["bcp"])

    def full_spec(arr):
        nd = arr.ndim
        return pl.BlockSpec(arr.shape, lambda *_: (0,) * nd)

    out_pad = pl.pallas_call(
        mlp_kernel,
        out_shape=jax.ShapeDtypeStruct((N, LANE), jnp.float32),
        grid=(),
        in_specs=[full_spec(a) for a in args],
        out_specs=pl.BlockSpec((N, LANE), lambda: (0, 0)),
    )(*args)
    return out_pad[:, :out_dim]


def init_params(key, input_dim, nnstructure, output_dim):
    """Deterministic init mirroring Net.initialize():
       Linear weights: kaiming_normal_ (fan_in, relu gain) -> std = sqrt(2 / fan_in)
       Linear biases:  PyTorch default uniform(-1/sqrt(fan_in), 1/sqrt(fan_in))
       BatchNorm: gamma=1, beta=0 (folded into the kernel).
       Also precomputes the lane-padded classifier weight/bias used by the kernel.
    """
    dims = [input_dim] + list(nnstructure) + [output_dim]
    params = {}
    names = ["1", "2", "c"]
    assert len(dims) - 1 == len(names)
    for i, name in enumerate(names):
        fan_in, fan_out = dims[i], dims[i + 1]
        key, kw, kb = jax.random.split(key, 3)
        std = math.sqrt(2.0 / fan_in)
        w = std * jax.random.normal(kw, (fan_in, fan_out), dtype=jnp.float32)
        bound = 1.0 / math.sqrt(fan_in)
        b = jax.random.uniform(kb, (1, fan_out), dtype=jnp.float32,
                               minval=-bound, maxval=bound)
        params[f"w{name}"] = w
        params[f"b{name}"] = b

    # Precomputed kernel operands (done once, not per forward call):
    hidden = nnstructure[-1]
    params["wcp"] = (jnp.zeros((hidden, LANE), jnp.float32)
                     .at[:, :output_dim].set(params["wc"]))
    params["bcp"] = (jnp.zeros((1, LANE), jnp.float32)
                     .at[:, :output_dim].set(params["bc"]))
    return params


if __name__ == "__main__":
    key = jax.random.PRNGKey(0)
    kx, kp = jax.random.split(key)

    # Shapes consistent with the module: input=2, nnstructure=[32, 32], output=2
    N, INPUT, HIDDEN, OUTPUT = 8, 2, 32, 2
    nnstructure = [HIDDEN, HIDDEN]

    x = jax.random.normal(kx, (N, INPUT), dtype=jnp.float32)
    params = init_params(kp, INPUT, nnstructure, OUTPUT)

    out = net_forward(x, params)
    jax.block_until_ready(out)

    # Pure-JAX reference of the ORIGINAL module math (includes b1/b2, two-pass
    # BN stats) — validates that the algebraic simplifications are exact.
    def ref(x, p):
        h = x @ p["w1"] + p["b1"]
        m = h.mean(0, keepdims=True); v = ((h - m) ** 2).mean(0, keepdims=True)
        h = jnp.maximum((h - m) / jnp.sqrt(v + EPS), 0.0)
        h = h @ p["w2"] + p["b2"]
        m = h.mean(0, keepdims=True); v = ((h - m) ** 2).mean(0, keepdims=True)
        h = jnp.maximum((h - m) / jnp.sqrt(v + EPS), 0.0)
        return h @ p["wc"] + p["bc"]

    assert out.shape == (N, OUTPUT)
    assert jnp.allclose(out, ref(x, params), atol=1e-4, rtol=1e-4)
    print("KERNEL_OK")
</pallas_src>

<mosaic_0001>
module attributes {stable_mosaic.version = 11 : i64} {
  func.func @mlp_kernel(%arg0: memref<8x2xf32, #tpu.memory_space<vmem>>, %arg1: memref<2x32xf32, #tpu.memory_space<vmem>>, %arg2: memref<32x32xf32, #tpu.memory_space<vmem>>, %arg3: memref<32x128xf32, #tpu.memory_space<vmem>>, %arg4: memref<1x128xf32, #tpu.memory_space<vmem>>, %arg5: memref<8x128xf32, #tpu.memory_space<vmem>>) attributes {dimension_semantics = [], scalar_prefetch = 0 : i64, scratch_operands = 0 : i64, tpu.core_type = #tpu.core_type<tc>} {
    %c0 = arith.constant 0 : index
    %c0_0 = arith.constant 0 : index
    %0 = vector.load %arg0[%c0, %c0_0] : memref<8x2xf32, #tpu.memory_space<vmem>>, vector<8x2xf32>
    %c0_1 = arith.constant 0 : index
    %c0_2 = arith.constant 0 : index
    %1 = vector.load %arg1[%c0_1, %c0_2] : memref<2x32xf32, #tpu.memory_space<vmem>>, vector<2x32xf32>
    %2 = vector.extract_strided_slice %0 {offsets = [0, 0], sizes = [8, 1], strides = [1, 1]} : vector<8x2xf32> to vector<8x1xf32>
    %3 = vector.extract_strided_slice %1 {offsets = [0, 0], sizes = [1, 32], strides = [1, 1]} : vector<2x32xf32> to vector<1x32xf32>
    %4 = vector.broadcast %2 : vector<8x1xf32> to vector<8x32xf32>
    %5 = vector.broadcast %3 : vector<1x32xf32> to vector<8x32xf32>
    %6 = arith.mulf %4, %5 : vector<8x32xf32>
    %7 = vector.extract_strided_slice %0 {offsets = [0, 1], sizes = [8, 1], strides = [1, 1]} : vector<8x2xf32> to vector<8x1xf32>
    %8 = vector.extract_strided_slice %1 {offsets = [1, 0], sizes = [1, 32], strides = [1, 1]} : vector<2x32xf32> to vector<1x32xf32>
    %9 = vector.broadcast %7 : vector<8x1xf32> to vector<8x32xf32>
    %10 = vector.broadcast %8 : vector<1x32xf32> to vector<8x32xf32>
    %11 = arith.mulf %9, %10 : vector<8x32xf32>
    %12 = arith.addf %6, %11 : vector<8x32xf32>
    %cst = arith.constant dense<0.000000e+00> : vector<32xf32>
    %13 = vector.multi_reduction <add>, %12, %cst [0] : vector<8x32xf32> to vector<32xf32>
    %14 = vector.shape_cast %13 : vector<32xf32> to vector<1x32xf32>
    %15 = arith.mulf %12, %12 : vector<8x32xf32>
    %cst_3 = arith.constant dense<0.000000e+00> : vector<32xf32>
    %16 = vector.multi_reduction <add>, %15, %cst_3 [0] : vector<8x32xf32> to vector<32xf32>
    %17 = vector.shape_cast %16 : vector<32xf32> to vector<1x32xf32>
    %cst_4 = arith.constant 1.250000e-01 : f32
    %18 = vector.broadcast %cst_4 : f32 to vector<1x32xf32>
    %19 = arith.mulf %14, %18 : vector<1x32xf32>
    %cst_5 = arith.constant 1.250000e-01 : f32
    %20 = vector.broadcast %cst_5 : f32 to vector<1x32xf32>
    %21 = arith.mulf %17, %20 : vector<1x32xf32>
    %22 = arith.mulf %19, %19 : vector<1x32xf32>
    %23 = arith.subf %21, %22 : vector<1x32xf32>
    %cst_6 = arith.constant 0.000000e+00 : f32
    %24 = vector.broadcast %cst_6 : f32 to vector<1x32xf32>
    %25 = arith.maximumf %23, %24 : vector<1x32xf32>
    %26 = vector.broadcast %19 : vector<1x32xf32> to vector<8x32xf32>
    %27 = arith.subf %12, %26 : vector<8x32xf32>
    %cst_7 = arith.constant 9.99999974E-6 : f32
    %28 = vector.broadcast %cst_7 : f32 to vector<1x32xf32>
    %29 = arith.addf %25, %28 : vector<1x32xf32>
    %30 = math.rsqrt %29 : vector<1x32xf32>
    %31 = vector.broadcast %30 : vector<1x32xf32> to vector<8x32xf32>
    %32 = arith.mulf %27, %31 : vector<8x32xf32>
    %cst_8 = arith.constant 0.000000e+00 : f32
    %33 = vector.broadcast %cst_8 : f32 to vector<8x32xf32>
    %34 = arith.maximumf %32, %33 : vector<8x32xf32>
    %c0_9 = arith.constant 0 : index
    %c0_10 = arith.constant 0 : index
    %35 = vector.load %arg2[%c0_9, %c0_10] : memref<32x32xf32, #tpu.memory_space<vmem>>, vector<32x32xf32>
    %cst_11 = arith.constant dense<0.000000e+00> : vector<8x32xf32>
    %36 = tpu.matmul %34, %35, %cst_11 {dimension_numbers = #tpu.dot_dimension_numbers<[1], [0], [0], [1], [0, 0, 1, 1], [], []>} : vector<8x32xf32>, vector<32x32xf32>, vector<8x32xf32> -> vector<8x32xf32>
    %cst_12 = arith.constant dense<0.000000e+00> : vector<32xf32>
    %37 = vector.multi_reduction <add>, %36, %cst_12 [0] : vector<8x32xf32> to vector<32xf32>
    %38 = vector.shape_cast %37 : vector<32xf32> to vector<1x32xf32>
    %39 = arith.mulf %36, %36 : vector<8x32xf32>
    %cst_13 = arith.constant dense<0.000000e+00> : vector<32xf32>
    %40 = vector.multi_reduction <add>, %39, %cst_13 [0] : vector<8x32xf32> to vector<32xf32>
    %41 = vector.shape_cast %40 : vector<32xf32> to vector<1x32xf32>
    %cst_14 = arith.constant 1.250000e-01 : f32
    %42 = vector.broadcast %cst_14 : f32 to vector<1x32xf32>
    %43 = arith.mulf %38, %42 : vector<1x32xf32>
    %cst_15 = arith.constant 1.250000e-01 : f32
    %44 = vector.broadcast %cst_15 : f32 to vector<1x32xf32>
    %45 = arith.mulf %41, %44 : vector<1x32xf32>
    %46 = arith.mulf %43, %43 : vector<1x32xf32>
    %47 = arith.subf %45, %46 : vector<1x32xf32>
    %cst_16 = arith.constant 0.000000e+00 : f32
    %48 = vector.broadcast %cst_16 : f32 to vector<1x32xf32>
    %49 = arith.maximumf %47, %48 : vector<1x32xf32>
    %50 = vector.broadcast %43 : vector<1x32xf32> to vector<8x32xf32>
    %51 = arith.subf %36, %50 : vector<8x32xf32>
    %cst_17 = arith.constant 9.99999974E-6 : f32
    %52 = vector.broadcast %cst_17 : f32 to vector<1x32xf32>
    %53 = arith.addf %49, %52 : vector<1x32xf32>
    %54 = math.rsqrt %53 : vector<1x32xf32>
    %55 = vector.broadcast %54 : vector<1x32xf32> to vector<8x32xf32>
    %56 = arith.mulf %51, %55 : vector<8x32xf32>
    %cst_18 = arith.constant 0.000000e+00 : f32
    %57 = vector.broadcast %cst_18 : f32 to vector<8x32xf32>
    %58 = arith.maximumf %56, %57 : vector<8x32xf32>
    %c0_19 = arith.constant 0 : index
    %c0_20 = arith.constant 0 : index
    %59 = vector.load %arg3[%c0_19, %c0_20] : memref<32x128xf32, #tpu.memory_space<vmem>>, vector<32x128xf32>
    %cst_21 = arith.constant dense<0.000000e+00> : vector<8x128xf32>
    %60 = tpu.matmul %58, %59, %cst_21 {dimension_numbers = #tpu.dot_dimension_numbers<[1], [0], [0], [1], [0, 0, 1, 1], [], []>} : vector<8x32xf32>, vector<32x128xf32>, vector<8x128xf32> -> vector<8x128xf32>
    %c0_22 = arith.constant 0 : index
    %c0_23 = arith.constant 0 : index
    %61 = vector.load %arg4[%c0_22, %c0_23] : memref<1x128xf32, #tpu.memory_space<vmem>>, vector<1x128xf32>
    %62 = vector.broadcast %61 : vector<1x128xf32> to vector<8x128xf32>
    %63 = arith.addf %60, %62 : vector<8x128xf32>
    %c0_24 = arith.constant 0 : index
    %c0_25 = arith.constant 0 : index
    %64 = vector.load %arg5[%c0_24, %c0_25] : memref<8x128xf32, #tpu.memory_space<vmem>>, vector<8x128xf32>
    tpu.vector_store %arg5[%c0_24, %c0_25], %63 {strides = array<i32>} : memref<8x128xf32, #tpu.memory_space<vmem>>, vector<8x128xf32>,
    return
  }
}

</mosaic_0001>

<bundles_post_ra>
// kernel: net_forward.1
= control target key start
LH: loop header
LB: loop body
LE: loop exit
PB: predicated region body
PF: predicated region fallthrough
CT: control target
= control target key end

     0   :  { %10 = vsyncpa [#allocation3], 0  ;;  %s480_s0 = inlined_call_operand.vmem [shape: f32[8,2], index: 0, kind: input, shape index: {}]   ;;  %s481_s1 = inlined_call_operand.vmem [shape: f32[2,32], index: 1, kind: input, shape index: {}]   ;;  %s482_s2 = inlined_call_operand.hbm [shape: f32[32,32], index: 2, kind: input, shape index: {}]   ;;  %s483_s3 = inlined_call_operand.hbm [shape: f32[32,128], index: 3, kind: input, shape index: {}]   ;;  %s484_s4 = inlined_call_operand.vmem [shape: f32[1,128], index: 4, kind: input, shape index: {}]   ;;  %s485_s5 = inlined_call_operand.vmem [shape: f32[8,128], index: 5, kind: output, shape index: {}]  }
   0x1   :  { %11 = vsyncpa [#allocation5], 0  ;;  %s399_s18 = smov [#allocation2]   ;;  %s351_s22 = scalar_lea.hbm %s482_s2, 512 }
   0x2   :  { %s21_s19 = sshll.u32 %s399_s18, 4  ;;  %p352_p0 = scmp.ne.s32.totalorder %s482_s2, %s351_s22  ;;  %s22_s19 = int_to_ptr.vmem [resolvable:$true] %s21_s19 }
   0x3   :  { %p355_p1 = scmp.lt.u32.totalorder %s351_s22, %s482_s2 }
   0x5   :  { %p357_p2 = pnand %p355_p1, %p352_p0 }
   0x7   :  { %360 = shalt.err (!%p357_p2)
}
   0x8   :  { %s361_s27 = scalar_lea.vmem %s22_s19, 512  ;;  %p366_p4 = scmp.lt.s32.totalorder %s22_s19, %s22_s19 }
   0x9   :  { %p362_p3 = scmp.ne.s32.totalorder %s22_s19, %s361_s27  ;;  %p367_p5 = scmp.lt.s32.totalorder %s361_s27, %s361_s27 }
   0xb   :  { %p368_p6 = por %p367_p5, %p366_p4 }
   0xd   :  { %p369_p7 = pnand %p368_p6, %p362_p3 }
   0xf   :  { %372 = shalt.err (!%p369_p7)
}
  0x10   :  { %s400_s28 = smov 128   ;;  %s401_s29 = smov 8  }
  0x11   :  { %27 = dma.hbm_to_vmem [thread:$0]  %s482_s2, 512, %s22_s19, [#allocation3], %s400_s28, %s400_s28, %s401_s29  }
  0x12   :  { %s402_s7 = smov [#allocation4]   ;;  %s373_s11 = scalar_lea.hbm %s483_s3, 512 }
  0x13   :  { %s33_s8 = sshll.u32 %s402_s7, 4  ;;  %p374_p8 = scmp.ne.s32.totalorder %s483_s3, %s373_s11  ;;  %s34_s8 = int_to_ptr.vmem [resolvable:$true] %s33_s8 }
  0x14   :  { %p377_p9 = scmp.lt.u32.totalorder %s373_s11, %s483_s3 }
  0x16   :  { %p379_p10 = pnand %p377_p9, %p374_p8 }
  0x18   :  { %382 = shalt.err (!%p379_p10)
}
  0x19   :  { %s383_s16 = scalar_lea.vmem %s34_s8, 512  ;;  %p388_p12 = scmp.lt.s32.totalorder %s34_s8, %s34_s8 }
  0x1a   :  { %p384_p11 = scmp.ne.s32.totalorder %s34_s8, %s383_s16  ;;  %p389_p13 = scmp.lt.s32.totalorder %s383_s16, %s383_s16 }
  0x1c   :  { %p390_p0 = por %p389_p13, %p388_p12 }
  0x1e   :  { %p391_p1 = pnand %p390_p0, %p384_p11 }
  0x20   :  { %394 = shalt.err (!%p391_p1)
}
  0x21   :  { %39 = dma.hbm_to_vmem [thread:$0]  %s483_s3, 512, %s34_s8, [#allocation5], %s400_s28, %s400_s28, %s401_s29  }
  0x22   :  { %395 = dma.done.wait [#allocation3], 512  }
  0x23   :  { %396 = vsyncadd [#allocation3], 4294966784 }
  0x24   :  { %397 = dma.done.wait [#allocation5], 512  }
  0x25   :  { %398 = vsyncadd [#allocation5], 4294966784  ;;  %v403_v0 = vmov 0   ;;  %v48_v1 = vld [vmem:[%s480_s0] sm:$0xff]  ;;  %v404_v2 = vmov 1   ;;  %v97_v4 = vld [vmem:[#allocation2 + $0x8] sm:$0xff]  ;;  %v55_v11 = vlaneseq }
  0x26   :  { %345 = vset.pattern.permute.xlu0 %v403_v0  ;;  %v96_v3 = vld [vmem:[#allocation2] sm:$0xff]  ;;  %v98_v5 = vld [vmem:[#allocation2 + $0x10] sm:$0xff]  ;;  %v405_v6 = vmov 0.0|0.0   ;;  %v99_v8 = vld [vmem:[#allocation2 + $0x18] sm:$0xff]  ;;  %vm406_vm0 = vmmov 0   ;;  %v407_v9 = vmov 0.0  }
  0x27   :  { %52 = vperm.xlu0 %345, %v48_v1   ;;  %324 = vmatprep.subr.bf16.mxu0 %v405_v6  ;;  %v325_v7 = vpack.c.bf16 %v97_v4, %v96_v3  ;;  %v328_v10 = vpack.c.bf16 %v99_v8, %v98_v5  ;;  %v56_v12 = vshrl.u32 %v55_v11, 7  ;;  %v49_v15 = vld [vmem:[%s481_s1] sm:$0x3]  ;;  %vm70_vm1 = vcmask 261120   ;;  %v199_v49 = vld [vmem:[#allocation4 + $0x8] sm:$0xff]  ;;  %v200_v51 = vld [vmem:[#allocation4 + $0x10] sm:$0xff] }
  0x28   :  { %310 = vmatprep.mubr.msk.f32.mxu0 %vm406_vm0, %v407_v9  ;;  %330 = vmatprep.subr.bf16.mxu1 %v405_v6  ;;  %v198_v48 = vld [vmem:[#allocation4] sm:$0xff]  ;;  %v201_v52 = vld [vmem:[#allocation4 + $0x18] sm:$0xff] }
  0x29   :  { %321 = vmatprep.mubr.msk.f32.mxu1 %vm406_vm0, %v407_v9  ;;  %326 = vmatpush3.bf16.msra.mxu0 %v325_v7  ;;  %v57_v13 = vsub.s32 0, %v56_v12  ;;  %v66_v14 = vsub.s32 1, %v56_v12  ;;  %v331_v50 = vpack.c.bf16 %v199_v49, %v198_v48  ;;  %v334_v53 = vpack.c.bf16 %v201_v52, %v200_v51 }
  0x2a   :  { %327 = vmatprep.subr.bf16.mxu0 %v405_v6 }
  0x2b   :  { %346 = vset.pattern.permute.xlu0 %v404_v2  ;;  %v58_v17 = vrot.slane %v49_v15, %v57_v13  ;;  %v67_v18 = vrot.slane %v49_v15, %v66_v14  ;;  %332 = vmatpush3.bf16.msra.mxu1 %v331_v50 }
  0x2c   :  { %61 = vperm.xlu0 %346, %v48_v1   ;;  %333 = vmatprep.subr.bf16.mxu1 %v405_v6 }
  0x2d   :  { %329 = vmatpush3.bf16.msra.mxu0 %v328_v10 }
  0x2f   :  { %335 = vmatpush3.bf16.msra.mxu1 %v334_v53 }
  0xa6   :  { %v53_v16 = vpop.permute.xlu0 %52 }
  0xa7   :  { %v59_v20 = vmul.f32 %v58_v17, %v53_v16  ;;  %v290_v17 = vld [vmem:[%s484_s4] ss:$0 sm:$0xff] }
  0xab   :  { %v62_v19 = vpop.permute.xlu0 %61 }
  0xac   :  { %v68_v21 = vmul.f32 %v67_v18, %v62_v19 }
  0xae   :  { %v69_v22 = vadd.f32 %v68_v21, %v59_v20 }
  0xb0   :  { %v71_v23 = vsel %vm70_vm1, %v69_v22, 0.0  ;;  %v78_v24 = vmul.f32 %v69_v22, %v69_v22 }
  0xb1   :  { %v72_v25 = vrot.slane %v71_v23, 4 }
  0xb2   :  { %v79_v26 = vsel %vm70_vm1, %v78_v24, 0.0 }
  0xb3   :  { %v73_v27 = vadd.f32 %v72_v25, %v71_v23  ;;  %v80_v28 = vrot.slane %v79_v26, 4 }
  0xb5   :  { %v74_v29 = vrot.slane %v73_v27, 2  ;;  %v81_v30 = vadd.f32 %v80_v28, %v79_v26 }
  0xb7   :  { %v75_v31 = vadd.f32 %v74_v29, %v73_v27  ;;  %v82_v32 = vrot.slane %v81_v30, 2 }
  0xb9   :  { %v76_v33 = vrot.slane %v75_v31, 1  ;;  %v83_v34 = vadd.f32 %v82_v32, %v81_v30 }
  0xbb   :  { %v77_v35 = vadd.f32 %v76_v33, %v75_v31  ;;  %v84_v36 = vrot.slane %v83_v34, 1 }
  0xbd   :  { %v85_v37 = vadd.f32 %v84_v36, %v83_v34  ;;  %v86_v38 = vmul.f32 0.125, %v77_v35 }
  0xbf   :  { %v87_v39 = vmul.f32 0.125, %v85_v37  ;;  %v88_v40 = vmul.f32 %v86_v38, %v86_v38  ;;  %v91_v44 = vsub.f32 %v69_v22, %v86_v38 }
  0xc1   :  { %v89_v41 = vsub.f32 %v87_v39, %v88_v40 }
  0xc3   :  { %v90_v42 = vmax.f32 %v89_v41, 0.0 }
  0xc5   :  { %v92_v43 = vadd.f32 1e-05, %v90_v42 }
  0xc7   :  { %347 = vrsqrt.f32 %v92_v43 }
  0xd1   :  { %v348_v45 = vpop.eup %347 }
  0xd2   :  { %v94_v46 = vmul.f32 %v348_v45, %v91_v44 }
  0xd4   :  { %v95_v47 = vmax.f32 %v94_v46, 0.0 }
  0xd6   :  { %311 = vmatmul.mubr.msk.f32.vlgmr.msra.gmra.mrb[0].mxu0 %vm70_vm1, %v95_v47 }
 0x1a9   :  { %v169_v54 = vpop.f32.mrb[0].mxu0 }
 0x1aa   :  { %v173_v55 = vsel %vm70_vm1, %v169_v54, 0.0  ;;  %v180_v56 = vmul.f32 %v169_v54, %v169_v54  ;;  %v312_v57 = vpop.f32.mrb[1].mxu0 }
 0x1ab   :  { %v174_v58 = vrot.slane %v173_v55, 4 }
 0x1ac   :  { %v181_v59 = vsel %vm70_vm1, %v180_v56, 0.0 }
 0x1ad   :  { %v175_v60 = vadd.f32 %v174_v58, %v173_v55  ;;  %v182_v61 = vrot.slane %v181_v59, 4 }
 0x1af   :  { %v176_v62 = vrot.slane %v175_v60, 2  ;;  %v183_v63 = vadd.f32 %v182_v61, %v181_v59 }
 0x1b1   :  { %v177_v0 = vadd.f32 %v176_v62, %v175_v60  ;;  %v184_v1 = vrot.slane %v183_v63, 2 }
 0x1b3   :  { %v178_v2 = vrot.slane %v177_v0, 1  ;;  %v185_v3 = vadd.f32 %v184_v1, %v183_v63 }
 0x1b5   :  { %v179_v4 = vadd.f32 %v178_v2, %v177_v0  ;;  %v186_v5 = vrot.slane %v185_v3, 1 }
 0x1b7   :  { %v187_v6 = vadd.f32 %v186_v5, %v185_v3  ;;  %v188_v7 = vmul.f32 0.125, %v179_v4 }
 0x1b9   :  { %v189_v8 = vmul.f32 0.125, %v187_v6  ;;  %v190_v9 = vmul.f32 %v188_v7, %v188_v7  ;;  %v193_v13 = vsub.f32 %v169_v54, %v188_v7 }
 0x1bb   :  { %v191_v10 = vsub.f32 %v189_v8, %v190_v9 }
 0x1bd   :  { %v192_v11 = vmax.f32 %v191_v10, 0.0 }
 0x1bf   :  { %v194_v12 = vadd.f32 1e-05, %v192_v11 }
 0x1c1   :  { %349 = vrsqrt.f32 %v194_v12 }
 0x1cb   :  { %v350_v14 = vpop.eup %349 }
 0x1cc   :  { %v196_v15 = vmul.f32 %v350_v14, %v193_v13 }
 0x1ce   :  { %v197_v16 = vmax.f32 %v196_v15, 0.0 }
 0x1d0   :  { %322 = vmatmul.mubr.msk.f32.vlgmr.msra.gmra.mrb[0].mxu1 %vm70_vm1, %v197_v16 }
 0x2a3   :  { %v278_v18 = vpop.f32.mrb[0].mxu1 }
 0x2a4   :  { %v279_v19 = vadd.f32 %v290_v17, %v278_v18  ;;  %v323_v20 = vpop.f32.mrb[1].mxu1 }
 0x2a6   :  { %282 = vst [vmem:[%s485_s5] sm:$0xff] %v279_v19 }
 0x2a7   :  { %287 = vsyncpa [#allocation3], 1 }
 0x2a8   :  { %288 = vsyncpa [#allocation5], 1 }

</bundles_post_ra>
